<compile_context>
chip_gen: v7x
topology: tpu7x:2x2x1
jax: 0.10.0
libtpu: 0.0.40
codegen_flags: <defaults>
</compile_context>

<pallas_src>
import jax
import jax.numpy as jnp
from jax.experimental import pallas as pl
from jax.experimental.pallas import tpu as pltpu

_SQRT_EPS_F32 = float(jnp.sqrt(jnp.finfo(jnp.float32).eps))
_HALF_LOG_2PI = 0.5 * float(jnp.log(2.0 * jnp.pi))

_LANES = 128


def _ziln_kernel(data_ref, loss_ref):
    # data_ref: (4, tile_rows, 128) f32; each row is a lane-dense slab.
    labels = data_ref[0]
    p_logit = data_ref[1]
    mean = data_ref[2]
    scale_raw = data_ref[3]

    positive = (labels > 0.0).astype(jnp.float32)

    # binary_cross_entropy_with_logits(x, z) = max(x,0) - x*z + log1p(exp(-|x|))
    classification_loss = (
        jnp.maximum(p_logit, 0.0)
        - p_logit * positive
        + jnp.log1p(jnp.exp(-jnp.abs(p_logit)))
    )

    # softplus(x) = max(x,0) + log1p(exp(-|x|)); clamp at sqrt(eps_f32)
    scale = jnp.maximum(scale_raw, 0.0) + jnp.log1p(jnp.exp(-jnp.abs(scale_raw)))
    scale = jnp.maximum(scale, _SQRT_EPS_F32)

    # Replace zero labels with 1 so log() is finite (masked by `positive`).
    stable_labels = jnp.where(labels > 0.0, labels, 1.0)
    log_x = jnp.log(stable_labels)

    # LogNormal(mean, scale).log_prob(x) =
    #   -0.5*((log x - mu)/scale)^2 - log(scale) - log(x) - 0.5*log(2*pi)
    d = (log_x - mean) / scale            # exact divide: parity with reference
    log_prob = -0.5 * d * d - jnp.log(scale) - log_x - _HALF_LOG_2PI

    # regression_loss = -mean(positive * log_prob, axis=-1) with last-dim size 1
    loss_ref[...] = classification_loss - positive * log_prob


def ziln_loss(labels, logits, *, max_tile_rows=2048):
    """labels: [B, 1], logits: [B, 3] -> per-example loss: [B] (float32)."""
    assert logits.shape == labels.shape[:-1] + (3,), "Logits shape is not compatible."
    B = labels.shape[0]

    # ---- Row-slab geometry (balanced tiles, >=2 tiles for v7x megacore) ----
    rows_needed = pl.cdiv(B, _LANES)
    n_tiles = pl.cdiv(rows_needed, max_tile_rows)
    if n_tiles == 1 and rows_needed >= 16:
        n_tiles = 2                              # keep both v7x TCs busy
    tile_rows = ((pl.cdiv(rows_needed, n_tiles) + 7) // 8) * 8   # f32: mult of 8
    R = n_tiles * tile_rows
    B_pad = R * _LANES
    pad = B_pad - B

    # ---- Single packed (4, R, 128) slab: labels, p_logit, mu, sigma_raw ----
    # One fused transpose + pad + reshape pass; zero padding is safe (finite
    # garbage in the tail, discarded by the final [:B] slice).
    packed = jnp.concatenate(
        [labels.astype(jnp.float32), logits.astype(jnp.float32)], axis=-1
    )                                            # (B, 4)
    packed = jnp.pad(packed.T, ((0, 0), (0, pad))).reshape(4, R, _LANES)

    n_elem = B_pad
    out = pl.pallas_call(
        _ziln_kernel,
        out_shape=jax.ShapeDtypeStruct((R, _LANES), jnp.float32),
        grid=(n_tiles,),
        in_specs=[
            pl.BlockSpec((4, tile_rows, _LANES), lambda i: (0, i, 0)),
        ],
        out_specs=pl.BlockSpec((tile_rows, _LANES), lambda i: (i, 0)),
        compiler_params=pltpu.CompilerParams(
            dimension_semantics=("parallel",),
        ),
        cost_estimate=pl.CostEstimate(
            flops=25 * n_elem,
            transcendentals=7 * n_elem,          # 2 exp, 2 log1p, 2 log, 1 div
            bytes_accessed=20 * n_elem,          # 4 f32 in + 1 f32 out
        ),
    )(packed)

    return out.reshape(-1)[:B]   # [B]


def _ziln_loss_ref(labels, logits):
    """Pure-JAX reference mirroring the PyTorch module (per-example loss [B])."""
    labels = labels.astype(jnp.float32)
    logits = logits.astype(jnp.float32)
    positive = (labels > 0.0).astype(jnp.float32)
    x = logits[:, 0:1]
    cls = jnp.maximum(x, 0.0) - x * positive + jnp.log1p(jnp.exp(-jnp.abs(x)))
    mean = logits[:, 1:2]
    scale = jax.nn.softplus(logits[:, 2:3])
    scale = jnp.maximum(scale, _SQRT_EPS_F32)
    stable_labels = positive * labels + (1.0 - positive)
    log_x = jnp.log(stable_labels)
    log_prob = (-((log_x - mean) ** 2) / (2.0 * scale * scale)
                - jnp.log(scale) - log_x - _HALF_LOG_2PI)
    reg = -jnp.mean(positive * log_prob, axis=-1)
    return cls[:, 0] + reg


if __name__ == "__main__":
    key = jax.random.PRNGKey(0)
    k1, k2 = jax.random.split(key)

    B = 8
    # Zero-inflated labels: roughly half zero, half positive LTV-like values.
    raw = jax.random.normal(k1, (B, 1), dtype=jnp.float32)
    labels = jnp.where(raw > 0.0, jnp.exp(raw), 0.0)
    logits = jax.random.normal(k2, (B, 3), dtype=jnp.float32)

    loss = ziln_loss(labels, logits)
    jax.block_until_ready(loss)

    assert loss.shape == (B,)
    assert bool(jnp.all(jnp.isfinite(loss)))

    # Parity check (exact divide in-kernel -> f32 rounding only).
    ref = _ziln_loss_ref(labels, logits)
    assert bool(jnp.max(jnp.abs(loss - ref)) < 1e-3), (loss, ref)

    print("KERNEL_OK")
</pallas_src>

<mosaic_0001>
module attributes {stable_mosaic.version = 11 : i64} {
  func.func @_ziln_kernel(%arg0: i32, %arg1: memref<4x8x128xf32, #tpu.memory_space<vmem>>, %arg2: memref<8x128xf32, #tpu.memory_space<vmem>>) attributes {dimension_semantics = [#tpu.dimension_semantics<parallel>], iteration_bounds = array<i64: 1>, scalar_prefetch = 0 : i64, scratch_operands = 0 : i64, tpu.core_type = #tpu.core_type<tc>, window_params = [{transform_indices = @transform_0, window_bounds = array<i64: 4, 8, 128>}, {transform_indices = @transform_1, window_bounds = array<i64: 8, 128>}]} {
    %c0 = arith.constant 0 : index
    %c0_0 = arith.constant 0 : index
    %c0_1 = arith.constant 0 : index
    %0 = vector.load %arg1[%c0, %c0_0, %c0_1] : memref<4x8x128xf32, #tpu.memory_space<vmem>>, vector<1x8x128xf32>
    %1 = vector.shape_cast %0 : vector<1x8x128xf32> to vector<8x128xf32>
    %c1 = arith.constant 1 : index
    %c0_2 = arith.constant 0 : index
    %c0_3 = arith.constant 0 : index
    %2 = vector.load %arg1[%c1, %c0_2, %c0_3] : memref<4x8x128xf32, #tpu.memory_space<vmem>>, vector<1x8x128xf32>
    %3 = vector.shape_cast %2 : vector<1x8x128xf32> to vector<8x128xf32>
    %c2 = arith.constant 2 : index
    %c0_4 = arith.constant 0 : index
    %c0_5 = arith.constant 0 : index
    %4 = vector.load %arg1[%c2, %c0_4, %c0_5] : memref<4x8x128xf32, #tpu.memory_space<vmem>>, vector<1x8x128xf32>
    %5 = vector.shape_cast %4 : vector<1x8x128xf32> to vector<8x128xf32>
    %c3 = arith.constant 3 : index
    %c0_6 = arith.constant 0 : index
    %c0_7 = arith.constant 0 : index
    %6 = vector.load %arg1[%c3, %c0_6, %c0_7] : memref<4x8x128xf32, #tpu.memory_space<vmem>>, vector<1x8x128xf32>
    %7 = vector.shape_cast %6 : vector<1x8x128xf32> to vector<8x128xf32>
    %cst = arith.constant 0.000000e+00 : f32
    %8 = vector.broadcast %cst : f32 to vector<8x128xf32>
    %9 = arith.cmpf ogt, %1, %8 : vector<8x128xf32>
    %10 = arith.extui %9 : vector<8x128xi1> to vector<8x128xi32>
    %11 = arith.sitofp %10 : vector<8x128xi32> to vector<8x128xf32>
    %cst_8 = arith.constant 0.000000e+00 : f32
    %12 = vector.broadcast %cst_8 : f32 to vector<8x128xf32>
    %13 = arith.maximumf %3, %12 : vector<8x128xf32>
    %14 = arith.mulf %3, %11 : vector<8x128xf32>
    %15 = arith.subf %13, %14 : vector<8x128xf32>
    %16 = math.absf %3 : vector<8x128xf32>
    %cst_9 = arith.constant 0.000000e+00 : f32
    %17 = vector.broadcast %cst_9 : f32 to vector<8x128xf32>
    %18 = arith.subf %17, %16 : vector<8x128xf32>
    %19 = math.exp %18 : vector<8x128xf32>
    %20 = math.log1p %19 : vector<8x128xf32>
    %21 = arith.addf %15, %20 : vector<8x128xf32>
    %cst_10 = arith.constant 0.000000e+00 : f32
    %22 = vector.broadcast %cst_10 : f32 to vector<8x128xf32>
    %23 = arith.maximumf %7, %22 : vector<8x128xf32>
    %24 = math.absf %7 : vector<8x128xf32>
    %cst_11 = arith.constant 0.000000e+00 : f32
    %25 = vector.broadcast %cst_11 : f32 to vector<8x128xf32>
    %26 = arith.subf %25, %24 : vector<8x128xf32>
    %27 = math.exp %26 : vector<8x128xf32>
    %28 = math.log1p %27 : vector<8x128xf32>
    %29 = arith.addf %23, %28 : vector<8x128xf32>
    %cst_12 = arith.constant 3.45266977E-4 : f32
    %30 = vector.broadcast %cst_12 : f32 to vector<8x128xf32>
    %31 = arith.maximumf %29, %30 : vector<8x128xf32>
    %cst_13 = arith.constant 0.000000e+00 : f32
    %32 = vector.broadcast %cst_13 : f32 to vector<8x128xf32>
    %33 = arith.cmpf ogt, %1, %32 : vector<8x128xf32>
    %cst_14 = arith.constant 1.000000e+00 : f32
    %34 = vector.broadcast %cst_14 : f32 to vector<8x128xf32>
    %35 = arith.select %33, %1, %34 : vector<8x128xi1>, vector<8x128xf32>
    %36 = math.log %35 : vector<8x128xf32>
    %37 = arith.subf %36, %5 : vector<8x128xf32>
    %38 = arith.divf %37, %31 : vector<8x128xf32>
    %cst_15 = arith.constant -5.000000e-01 : f32
    %39 = vector.broadcast %cst_15 : f32 to vector<8x128xf32>
    %40 = arith.mulf %39, %38 : vector<8x128xf32>
    %41 = arith.mulf %40, %38 : vector<8x128xf32>
    %42 = math.log %31 : vector<8x128xf32>
    %43 = arith.subf %41, %42 : vector<8x128xf32>
    %44 = arith.subf %43, %36 : vector<8x128xf32>
    %cst_16 = arith.constant 0.918938517 : f32
    %45 = vector.broadcast %cst_16 : f32 to vector<8x128xf32>
    %46 = arith.subf %44, %45 : vector<8x128xf32>
    %47 = arith.mulf %11, %46 : vector<8x128xf32>
    %48 = arith.subf %21, %47 : vector<8x128xf32>
    %c0_17 = arith.constant 0 : index
    %c0_18 = arith.constant 0 : index
    %49 = vector.load %arg2[%c0_17, %c0_18] : memref<8x128xf32, #tpu.memory_space<vmem>>, vector<8x128xf32>
    tpu.vector_store %arg2[%c0_17, %c0_18], %48 {strides = array<i32>} : memref<8x128xf32, #tpu.memory_space<vmem>>, vector<8x128xf32>,
    return
  }
  func.func @transform_0(%arg0: i32) -> (i32, i32, i32) {
    %c0_i32 = arith.constant 0 : i32
    %c0_i32_0 = arith.constant 0 : i32
    %c0_i32_1 = arith.constant 0 : i32
    return %c0_i32, %arg0, %c0_i32_0 : i32, i32, i32
  }
  func.func @transform_1(%arg0: i32) -> (i32, i32) {
    %c0_i32 = arith.constant 0 : i32
    %c0_i32_0 = arith.constant 0 : i32
    return %arg0, %c0_i32 : i32, i32
  }
}

</mosaic_0001>

<bundles_post_ra>
// kernel: tpu_custom_call.1
= control target key start
LH: loop header
LB: loop body
LE: loop exit
PB: predicated region body
PF: predicated region fallthrough
CT: control target
= control target key end

     0   :  { %6 = vsyncpa [#allocation3], 0  ;;  %s207_s0 = inlined_call_operand.hbm [shape: f32[4,8,128], index: 0, kind: input, shape index: {}]   ;;  %s208_s1 = inlined_call_operand.hbm [shape: f32[8,128], index: 1, kind: output, shape index: {}]  }
   0x1   :  { %7 = vsyncpa [#allocation4], 0  ;;  %s166_s6 = smov [#allocation2]   ;;  %s118_s10 = scalar_lea.hbm %s207_s0, 512 }
   0x2   :  { %s13_s7 = sshll.u32 %s166_s6, 4  ;;  %p119_p0 = scmp.ne.s32.totalorder %s207_s0, %s118_s10  ;;  %s14_s7 = int_to_ptr.vmem [resolvable:$true] %s13_s7 }
   0x3   :  { %p122_p1 = scmp.lt.u32.totalorder %s118_s10, %s207_s0 }
   0x5   :  { %p124_p2 = pnand %p122_p1, %p119_p0 }
   0x7   :  { %127 = shalt.err (!%p124_p2)
}
   0x8   :  { %s128_s15 = scalar_lea.vmem %s14_s7, 512  ;;  %p133_p4 = scmp.lt.s32.totalorder %s14_s7, %s14_s7 }
   0x9   :  { %p129_p3 = scmp.ne.s32.totalorder %s14_s7, %s128_s15  ;;  %p134_p5 = scmp.lt.s32.totalorder %s128_s15, %s128_s15 }
   0xb   :  { %p135_p6 = por %p134_p5, %p133_p4 }
   0xd   :  { %p136_p7 = pnand %p135_p6, %p129_p3 }
   0xf   :  { %139 = shalt.err (!%p136_p7)
}
  0x10   :  { %s167_s16 = smov 128   ;;  %s168_s17 = smov 8  }
  0x11   :  { %19 = dma.hbm_to_vmem [thread:$0]  %s207_s0, 512, %s14_s7, [#allocation3], %s167_s16, %s167_s16, %s168_s17  }
  0x12   :  { %162 = dma.done.wait [#allocation3], 512  }
  0x13   :  { %163 = vsyncadd [#allocation3], 4294966784  ;;  %v29_v0 = vld [vmem:[#allocation2 + $0x18] sm:$0xff]  ;;  %v25_v3 = vld [vmem:[#allocation2 + $0x8] sm:$0xff]  ;;  %v169_v31 = vmov 0.0   ;;  %s170_s0 = smov [#allocation5]  }
  0x14   :  { %v51_v1 = vand.u32 2147483647, %v29_v0  ;;  %v36_v5 = vand.u32 2147483647, %v25_v3  ;;  %v23_v10 = vld [vmem:[#allocation2] sm:$0xff]  ;;  %v50_v18 = vmax.f32 %v29_v0, 0.0 }
  0x15   :  { %vm30_vm0 = vcmp.gt.f32.partialorder %v23_v10, 0.0  ;;  %v27_v26 = vld [vmem:[#allocation2 + $0x10] sm:$0xff]  ;;  %v33_v37 = vmax.f32 %v25_v3, 0.0  ;;  %s88_s20 = sshll.u32 %s170_s0, 4  ;;  %s89_s20 = int_to_ptr.vmem [resolvable:$true] %s88_s20 }
  0x16   :  { %v52_v2 = vsub.f32 0.0, %v51_v1  ;;  %v37_v6 = vsub.f32 0.0, %v36_v5  ;;  %v66_v13 = vsel %vm30_vm0, %v23_v10, 1.0  ;;  %v97_v32 = vsel %vm30_vm0, 1.0, %v169_v31  ;;  %s140_s21 = scalar_lea.vmem %s89_s20, 128  ;;  %p145_p9 = scmp.lt.s32.totalorder %s89_s20, %s89_s20 }
  0x17   :  { %v34_v38 = vmul.f32 %v97_v32, %v25_v3  ;;  %p141_p8 = scmp.ne.s32.totalorder %s89_s20, %s140_s21  ;;  %p146_p10 = scmp.lt.s32.totalorder %s140_s21, %s140_s21 }
  0x18   :  { %v53_v4 = vmul.f32 1.442695, %v52_v2  ;;  %v38_v7 = vmul.f32 1.442695, %v37_v6 }
  0x19   :  { %v35_v44 = vsub.f32 %v33_v37, %v34_v38  ;;  %p147_p11 = por %p146_p10, %p145_p9 }
  0x1a   :  { %104 = vpow2.f32 %v53_v4 }
  0x1b   :  { %106 = vpow2.f32 %v38_v7  ;;  %p148_p12 = pnand %p147_p11, %p141_p8 }
  0x24   :  { %v105_v8 = vpop.eup %104 }
  0x25   :  { %v55_v9 = vadd.f32 1.0, %v105_v8  ;;  %v58_v11 = vmul.f32 -0.5, %v105_v8  ;;  %v61_v14 = vand.u32 2147483647, %v105_v8  ;;  %v107_v15 = vpop.eup %106 }
  0x26   :  { %v40_v20 = vadd.f32 1.0, %v107_v15  ;;  %v43_v27 = vmul.f32 -0.5, %v107_v15  ;;  %v46_v35 = vand.u32 2147483647, %v107_v15 }
  0x27   :  { %108 = vlog2.f32 %v55_v9  ;;  %v59_v12 = vadd.f32 1.0, %v58_v11  ;;  %vm62_vm1 = vcmp.lt.f32.partialorder %v61_v14, 0.0004427343 }
  0x28   :  { %110 = vlog2.f32 %v66_v13  ;;  %v44_v33 = vadd.f32 1.0, %v43_v27  ;;  %vm47_vm2 = vcmp.lt.f32.partialorder %v46_v35, 0.0004427343 }
  0x29   :  { %v60_v16 = vmul.f32 %v105_v8, %v59_v12  ;;  %112 = vlog2.f32 %v40_v20 }
  0x2a   :  { %v45_v42 = vmul.f32 %v107_v15, %v44_v33 }
  0x31   :  { %v109_v17 = vpop.eup %108 }
  0x32   :  { %v57_v19 = vmul.f32 0.6931472, %v109_v17  ;;  %v111_v24 = vpop.eup %110 }
  0x33   :  { %v68_v25 = vmul.f32 0.6931472, %v111_v24  ;;  %v113_v29 = vpop.eup %112 }
  0x34   :  { %v63_v21 = vsel %vm62_vm1, %v60_v16, %v57_v19  ;;  %v42_v41 = vmul.f32 0.6931472, %v113_v29 }
  0x35   :  { %v64_v22 = vadd.f32 %v63_v21, %v50_v18  ;;  %v69_v28 = vsub.f32 %v68_v25, %v27_v26 }
  0x36   :  { %v48_v46 = vsel %vm47_vm2, %v45_v42, %v42_v41 }
  0x37   :  { %v65_v23 = vmax.f32 %v64_v22, 0.00034526698  ;;  %v49_v48 = vadd.f32 %v48_v46, %v35_v44 }
  0x39   :  { %114 = vrcp.f32 %v65_v23 }
  0x3a   :  { %116 = vlog2.f32 %v65_v23 }
  0x43   :  { %v115_v30 = vpop.eup %114 }
  0x44   :  { %v117_v34 = vpop.eup %116  ;;  %v71_v36 = vmul.f32 %v115_v30, %v69_v28 }
  0x45   :  { %v75_v40 = vmul.f32 0.6931472, %v117_v34 }
  0x46   :  { %v72_v39 = vmul.f32 -0.5, %v71_v36 }
  0x48   :  { %v73_v43 = vmul.f32 %v72_v39, %v71_v36 }
  0x4a   :  { %v76_v45 = vsub.f32 %v73_v43, %v75_v40 }
  0x4c   :  { %v77_v47 = vsub.f32 %v76_v45, %v68_v25 }
  0x4e   :  { %v98_v49 = vadd.f32 -0.9189385, %v77_v47 }
  0x50   :  { %v79_v50 = vmul.f32 %v98_v49, %v97_v32 }
  0x52   :  { %v80_v51 = vsub.f32 %v49_v48, %v79_v50 }
  0x54   :  { %81 = vst [vmem:[#allocation5] sm:$0xff] %v80_v51 }
  0x55   :  { %151 = shalt.err (!%p148_p12)
}
  0x56   :  { %s152_s24 = scalar_lea.hbm %s208_s1, 128 }
  0x57   :  { %p153_p13 = scmp.ne.s32.totalorder %s208_s1, %s152_s24  ;;  %p156_p0 = scmp.lt.u32.totalorder %s152_s24, %s208_s1 }
  0x59   :  { %p158_p1 = pnand %p156_p0, %p153_p13 }
  0x5b   :  { %161 = shalt.err (!%p158_p1)
}
  0x5c   :  { %91 = dma.vmem_to_hbm [thread:$0]  %s89_s20, 128, %s208_s1, [#allocation4]  }
  0x5d   :  { %164 = dma.done.wait [#allocation4], 128  }
  0x5e   :  { %165 = vsyncadd [#allocation4], 4294967168 }
  0x5f   :  { %95 = vsyncpa [#allocation3], 1 }
  0x60   :  { %96 = vsyncpa [#allocation4], 1 }

</bundles_post_ra>
